<compile_context>
chip_gen: v5e
topology: v5e:2x2
jax: 0.10.0
libtpu: 0.0.40
codegen_flags: <defaults>
</compile_context>

<pallas_src>
import jax
import jax.numpy as jnp
from jax.experimental import pallas as pl
from jax.experimental.pallas import tpu as pltpu


def _round_up(n, m):
    return ((n + m - 1) // m) * m


def _mlp_kernel(x_ref, w1_ref, b1_ref, w23_ref, b23_ref, o_ref):
    # Fused f32 -> bf16 cast (saves a whole extra HBM pass done in XLA previously).
    xb = x_ref[...].astype(jnp.bfloat16)                                   # (TB, 1024)
    # fc1 + ReLU on the MXU with f32 accumulation.
    h1 = jnp.dot(xb, w1_ref[...], preferred_element_type=jnp.float32)      # (TB, 64)
    h1 = jnp.maximum(h1 + b1_ref[...], 0.0)
    # Fused fc2 + output layer: contract dim 1 of both (1,64)x(TB,64) -> (1, TB),
    # lane-dense result with no materialized h1 transpose.
    y = jax.lax.dot_general(
        w23_ref[...], h1,
        dimension_numbers=(((1,), (1,)), ((), ())),
        preferred_element_type=jnp.float32)                                # (1, TB)
    y = y + b23_ref[0, 0]                                                  # scalar bias (SMEM)
    # Exact f32 sigmoid; EUP exp + divide are free under the DMA (kernel is HBM-bound).
    o_ref[...] = (1.0 / (1.0 + jnp.exp(-y))).astype(o_ref.dtype)


def prepare_params(params):
    """One-time constant prep: bf16 fc1 weights + algebraic fusion of fc2/output."""
    w1t, b1, w2t, b2, w3t, b3 = params                  # weights stored as [in, out]
    w23_row = (w2t @ w3t).T                             # (1, 64)  f32
    b23 = (b2 @ w3t + b3).reshape(1, 1)                 # (1, 1)   f32
    return (
        w1t.astype(jnp.bfloat16),
        b1.astype(jnp.float32),
        w23_row.astype(jnp.float32),
        b23.astype(jnp.float32),
    )


def _pick_tile_b(B):
    Bp = _round_up(B, 8)                                # f32 sublane granularity
    if Bp <= 256:
        return Bp                                       # tiny batch: one tile
    # Keep ~4 grid steps (both v7x TCs get work) but cap at 2048 rows so the
    # double-buffered f32 activation tile (16 MiB) fits the scoped VMEM limit.
    return min(2048, _round_up(pl.cdiv(Bp, 4), 128))


def mlp_forward(x_img, prepared_params, tile_b=None):
    """x_img: [B, C, H, W] with C*H*W == 1024 (NCHW, as in PyTorch)."""
    B = x_img.shape[0]
    x = x_img.reshape(B, -1).astype(jnp.float32)        # flatten(x, 1): no-op copy for f32 NCHW
    F = x.shape[1]
    w1_bf16, b1, w23_row, b23 = prepared_params

    TB = _pick_tile_b(B) if tile_b is None else tile_b
    Bpad = _round_up(B, TB)
    if Bpad != B:                                       # only pad when B isn't a tile multiple
        x = jnp.pad(x, ((0, Bpad - B), (0, 0)))
    n_tiles = Bpad // TB

    # VMEM budget: double-buffered f32 activation tile + small weights/output headroom.
    act_dbl_buf = 2 * TB * F * 4
    compiler_params = pltpu.CompilerParams(
        dimension_semantics=("parallel",),              # shard batch tiles across TensorCores
        vmem_limit_bytes=max(32 << 20, act_dbl_buf + (4 << 20)),
    )

    out = pl.pallas_call(
        _mlp_kernel,
        out_shape=jax.ShapeDtypeStruct((n_tiles, TB), jnp.float32),
        grid=(n_tiles,),
        in_specs=[
            pl.BlockSpec((TB, F), lambda i: (i, 0)),                 # pipelined activation tile
            pl.BlockSpec(w1_bf16.shape, lambda i: (0, 0)),           # pinned fc1 weights
            pl.BlockSpec(b1.shape, lambda i: (0, 0)),                # pinned fc1 bias
            pl.BlockSpec(w23_row.shape, lambda i: (0, 0)),           # pinned fused fc2/out row
            pl.BlockSpec(memory_space=pltpu.MemorySpace.SMEM),       # fused scalar bias
        ],
        out_specs=pl.BlockSpec((1, TB), lambda i: (i, 0)),           # lane-dense output tile
        compiler_params=compiler_params,
    )(x, w1_bf16, b1, w23_row, b23)

    return out.reshape(Bpad)[:B].reshape(B, 1)


def init_params(key):
    """Deterministic init mimicking nn.Linear's U(-1/sqrt(fan_in), 1/sqrt(fan_in))."""
    def linear(key, fan_in, fan_out):
        kw, kb = jax.random.split(key)
        bound = 1.0 / jnp.sqrt(float(fan_in))
        w_t = jax.random.uniform(kw, (fan_in, fan_out), jnp.float32, -bound, bound)
        b = jax.random.uniform(kb, (1, fan_out), jnp.float32, -bound, bound)
        return w_t, b

    k1, k2, k3 = jax.random.split(key, 3)
    w1t, b1 = linear(k1, 32 * 32, 64)
    w2t, b2 = linear(k2, 64, 32)
    w3t, b3 = linear(k3, 32, 1)
    return (w1t, b1, w2t, b2, w3t, b3)


def reference_forward(x_img, params):
    """Plain-JAX f32 reference matching the PyTorch forward."""
    w1t, b1, w2t, b2, w3t, b3 = params
    x = x_img.reshape(x_img.shape[0], -1).astype(jnp.float32)
    h = jnp.maximum(x @ w1t + b1, 0.0)
    h = h @ w2t + b2
    h = h @ w3t + b3
    return jax.nn.sigmoid(h)


if __name__ == "__main__":
    key = jax.random.PRNGKey(0)
    kx, kp = jax.random.split(key)

    params = init_params(kp)
    prepared = prepare_params(params)          # constant prep hoisted out of the call path

    # fc1 needs 32*32 = 1024 input features: single-channel 32x32 "images" (NCHW).
    B = 2
    x_img = jax.random.normal(kx, (B, 1, 32, 32), dtype=jnp.float32)

    out = jax.block_until_ready(mlp_forward(x_img, prepared))
    ref = reference_forward(x_img, params)
    assert out.shape == (B, 1), out.shape
    # bf16 fc1 matmul vs f32 reference -> loose tolerance.
    assert jnp.allclose(out, ref, atol=2e-2, rtol=2e-2), (out, ref)

    # Multi-tile pipelined path: lane-dense TB=128, B a tile multiple (no padding copy).
    B2 = 256
    x_img2 = jax.random.normal(jax.random.PRNGKey(1), (B2, 1, 32, 32), dtype=jnp.float32)
    out2 = jax.block_until_ready(mlp_forward(x_img2, prepared, tile_b=128))
    ref2 = reference_forward(x_img2, params)
    assert out2.shape == (B2, 1), out2.shape
    assert jnp.allclose(out2, ref2, atol=2e-2, rtol=2e-2), (out2, ref2)

    print("KERNEL_OK")
</pallas_src>

<mosaic_0001>
module attributes {stable_mosaic.version = 11 : i64} {
  func.func @_mlp_kernel(%arg0: i32, %arg1: memref<8x1024xf32, #tpu.memory_space<vmem>>, %arg2: memref<1024x64xbf16, #tpu.memory_space<vmem>>, %arg3: memref<1x64xf32, #tpu.memory_space<vmem>>, %arg4: memref<1x64xf32, #tpu.memory_space<vmem>>, %arg5: memref<1x1xf32, #tpu.memory_space<smem>>, %arg6: memref<1x8xf32, #tpu.memory_space<vmem>>) attributes {dimension_semantics = [#tpu.dimension_semantics<parallel>], iteration_bounds = array<i64: 1>, scalar_prefetch = 0 : i64, scratch_operands = 0 : i64, tpu.core_type = #tpu.core_type<tc>, window_params = [{transform_indices = @transform_0, window_bounds = array<i64: 8, 1024>}, {pipeline_mode = #tpu.pipeline_mode<synchronous>, transform_indices = @transform_1, window_bounds = array<i64: 1024, 64>}, {pipeline_mode = #tpu.pipeline_mode<synchronous>, transform_indices = @transform_2, window_bounds = array<i64: 1, 64>}, {pipeline_mode = #tpu.pipeline_mode<synchronous>, transform_indices = @transform_3, window_bounds = array<i64: 1, 64>}, {transform_indices = @transform_4, window_bounds = array<i64: 1, 1>}, {transform_indices = @transform_5, window_bounds = array<i64: 1, 8>}]} {
    %c0 = arith.constant 0 : index
    %c0_0 = arith.constant 0 : index
    %0 = vector.load %arg1[%c0, %c0_0] : memref<8x1024xf32, #tpu.memory_space<vmem>>, vector<8x1024xf32>
    %1 = arith.truncf %0 : vector<8x1024xf32> to vector<8x1024xbf16>
    %c0_1 = arith.constant 0 : index
    %c0_2 = arith.constant 0 : index
    %2 = vector.load %arg2[%c0_1, %c0_2] : memref<1024x64xbf16, #tpu.memory_space<vmem>>, vector<1024x64xbf16>
    %cst = arith.constant dense<0.000000e+00> : vector<8x64xf32>
    %3 = tpu.matmul %1, %2, %cst {dimension_numbers = #tpu.dot_dimension_numbers<[1], [0], [0], [1], [0, 0, 1, 1], [], []>} : vector<8x1024xbf16>, vector<1024x64xbf16>, vector<8x64xf32> -> vector<8x64xf32>
    %c0_3 = arith.constant 0 : index
    %c0_4 = arith.constant 0 : index
    %4 = vector.load %arg3[%c0_3, %c0_4] : memref<1x64xf32, #tpu.memory_space<vmem>>, vector<1x64xf32>
    %5 = vector.broadcast %4 : vector<1x64xf32> to vector<8x64xf32>
    %6 = arith.addf %3, %5 : vector<8x64xf32>
    %cst_5 = arith.constant 0.000000e+00 : f32
    %7 = vector.broadcast %cst_5 : f32 to vector<8x64xf32>
    %8 = arith.maximumf %6, %7 : vector<8x64xf32>
    %c0_6 = arith.constant 0 : index
    %c0_7 = arith.constant 0 : index
    %9 = vector.load %arg4[%c0_6, %c0_7] : memref<1x64xf32, #tpu.memory_space<vmem>>, vector<1x64xf32>
    %cst_8 = arith.constant dense<0.000000e+00> : vector<1x8xf32>
    %10 = tpu.matmul %9, %8, %cst_8 {dimension_numbers = #tpu.dot_dimension_numbers<[1], [1], [0], [0], [0, 0, 1, 0], [], []>} : vector<1x64xf32>, vector<8x64xf32>, vector<1x8xf32> -> vector<1x8xf32>
    %c0_9 = arith.constant 0 : index
    %c0_10 = arith.constant 0 : index
    %11 = memref.load %arg5[%c0_9, %c0_10] : memref<1x1xf32, #tpu.memory_space<smem>>
    %12 = vector.broadcast %11 : f32 to vector<1x8xf32>
    %13 = arith.addf %10, %12 : vector<1x8xf32>
    %cst_11 = arith.constant 0.000000e+00 : f32
    %14 = vector.broadcast %cst_11 : f32 to vector<1x8xf32>
    %15 = arith.subf %14, %13 : vector<1x8xf32>
    %16 = math.exp %15 : vector<1x8xf32>
    %cst_12 = arith.constant 1.000000e+00 : f32
    %17 = vector.broadcast %cst_12 : f32 to vector<1x8xf32>
    %18 = arith.addf %17, %16 : vector<1x8xf32>
    %cst_13 = arith.constant 1.000000e+00 : f32
    %19 = vector.broadcast %cst_13 : f32 to vector<1x8xf32>
    %20 = arith.divf %19, %18 : vector<1x8xf32>
    %c0_14 = arith.constant 0 : index
    %c0_15 = arith.constant 0 : index
    %21 = vector.load %arg6[%c0_14, %c0_15] : memref<1x8xf32, #tpu.memory_space<vmem>>, vector<1x8xf32>
    tpu.vector_store %arg6[%c0_14, %c0_15], %20 {strides = array<i32>} : memref<1x8xf32, #tpu.memory_space<vmem>>, vector<1x8xf32>,
    return
  }
  func.func @transform_0(%arg0: i32) -> (i32, i32) {
    %c0_i32 = arith.constant 0 : i32
    %c0_i32_0 = arith.constant 0 : i32
    return %arg0, %c0_i32 : i32, i32
  }
  func.func @transform_1(%arg0: i32) -> (i32, i32) {
    %c0_i32 = arith.constant 0 : i32
    %c0_i32_0 = arith.constant 0 : i32
    %c0_i32_1 = arith.constant 0 : i32
    return %c0_i32, %c0_i32_0 : i32, i32
  }
  func.func @transform_2(%arg0: i32) -> (i32, i32) {
    %c0_i32 = arith.constant 0 : i32
    %c0_i32_0 = arith.constant 0 : i32
    %c0_i32_1 = arith.constant 0 : i32
    return %c0_i32, %c0_i32_0 : i32, i32
  }
  func.func @transform_3(%arg0: i32) -> (i32, i32) {
    %c0_i32 = arith.constant 0 : i32
    %c0_i32_0 = arith.constant 0 : i32
    %c0_i32_1 = arith.constant 0 : i32
    return %c0_i32, %c0_i32_0 : i32, i32
  }
  func.func @transform_4(%arg0: i32) -> (i32, i32) {
    %c0_i32 = arith.constant 0 : i32
    %c0_i32_0 = arith.constant 0 : i32
    %c0_i32_1 = arith.constant 0 : i32
    return %c0_i32, %c0_i32_0 : i32, i32
  }
  func.func @transform_5(%arg0: i32) -> (i32, i32) {
    %c0_i32 = arith.constant 0 : i32
    %c0_i32_0 = arith.constant 0 : i32
    return %arg0, %c0_i32 : i32, i32
  }
}

</mosaic_0001>

<bundles_post_ra>
// kernel: tpu_custom_call.1
= control target key start
LH: loop header
LB: loop body
LE: loop exit
PB: predicated region body
PF: predicated region fallthrough
CT: control target
= control target key end

     0   :  { %s1339_s0 = inlined_call_operand.vmem [shape: f32[8,1024], index: 0, kind: input, shape index: {}]   ;;  %s1340_s1 = inlined_call_operand.vmem [shape: bf16[1024,64], index: 1, kind: input, shape index: {}]   ;;  %s1341_s2 = inlined_call_operand.vmem [shape: f32[1,64], index: 2, kind: input, shape index: {}]   ;;  %s1342_s3 = inlined_call_operand.vmem [shape: f32[1,64], index: 3, kind: input, shape index: {}]   ;;  %s1343_s4 = inlined_call_operand.<no memory space> [shape: f32[1,1], index: 4, kind: input, shape index: {}]   ;;  %s1344_s5 = inlined_call_operand.hbm [shape: f32[1,8], index: 5, kind: output, shape index: {}]  }
   0x1   :  { %v991_v0 = vld [vmem:[%s1340_s1 + $0x38] sm:$0xff]  ;;  %v990_v4 = vld [vmem:[%s1340_s1 + $0x30] sm:$0xff]  ;;  %v989_v8 = vld [vmem:[%s1340_s1 + $0x28] sm:$0xff] }
   0x2   :  { %v999_v1 = vld [vmem:[%s1340_s1 + $0x78] sm:$0xff]  ;;  %554 = vmatpush.bf16.msra.mxu0 %v991_v0  ;;  %v998_v5 = vld [vmem:[%s1340_s1 + $0x70] sm:$0xff]  ;;  %v997_v9 = vld [vmem:[%s1340_s1 + $0x68] sm:$0xff] }
   0x3   :  { %v1007_v2 = vld [vmem:[%s1340_s1 + $0xb8] sm:$0xff]  ;;  %567 = vmatpush.bf16.msra.mxu1 %v999_v1  ;;  %v1006_v6 = vld [vmem:[%s1340_s1 + $0xb0] sm:$0xff]  ;;  %v1005_v10 = vld [vmem:[%s1340_s1 + $0xa8] sm:$0xff] }
   0x4   :  { %v1015_v3 = vld [vmem:[%s1340_s1 + $0xf8] sm:$0xff]  ;;  %580 = vmatpush.bf16.msra.mxu2 %v1007_v2  ;;  %v1014_v7 = vld [vmem:[%s1340_s1 + $0xf0] sm:$0xff]  ;;  %v1013_v11 = vld [vmem:[%s1340_s1 + $0xe8] sm:$0xff] }
   0x5   :  { %593 = vmatpush.bf16.msra.mxu3 %v1015_v3  ;;  %v988_v12 = vld [vmem:[%s1340_s1 + $0x20] sm:$0xff]  ;;  %v987_v16 = vld [vmem:[%s1340_s1 + $0x18] sm:$0xff]  ;;  %v986_v20 = vld [vmem:[%s1340_s1 + $0x10] sm:$0xff] }
   0x6   :  { %555 = vmatpush.bf16.msra.mxu0 %v990_v4  ;;  %v996_v13 = vld [vmem:[%s1340_s1 + $0x60] sm:$0xff]  ;;  %v995_v17 = vld [vmem:[%s1340_s1 + $0x58] sm:$0xff]  ;;  %v994_v21 = vld [vmem:[%s1340_s1 + $0x50] sm:$0xff] }
   0x7   :  { %568 = vmatpush.bf16.msra.mxu1 %v998_v5  ;;  %v1004_v14 = vld [vmem:[%s1340_s1 + $0xa0] sm:$0xff]  ;;  %v1003_v18 = vld [vmem:[%s1340_s1 + $0x98] sm:$0xff]  ;;  %v1002_v22 = vld [vmem:[%s1340_s1 + $0x90] sm:$0xff] }
   0x8   :  { %581 = vmatpush.bf16.msra.mxu2 %v1006_v6  ;;  %v1012_v15 = vld [vmem:[%s1340_s1 + $0xe0] sm:$0xff]  ;;  %v1011_v19 = vld [vmem:[%s1340_s1 + $0xd8] sm:$0xff]  ;;  %v1010_v23 = vld [vmem:[%s1340_s1 + $0xd0] sm:$0xff] }
   0x9   :  { %594 = vmatpush.bf16.msra.mxu3 %v1014_v7 }
   0xa   :  { %556 = vmatpush.bf16.msra.mxu0 %v989_v8 }
   0xb   :  { %569 = vmatpush.bf16.msra.mxu1 %v997_v9 }
   0xc   :  { %582 = vmatpush.bf16.msra.mxu2 %v1005_v10 }
   0xd   :  { %595 = vmatpush.bf16.msra.mxu3 %v1013_v11 }
   0xe   :  { %557 = vmatpush.bf16.msra.mxu0 %v988_v12 }
   0xf   :  { %570 = vmatpush.bf16.msra.mxu1 %v996_v13 }
  0x10   :  { %583 = vmatpush.bf16.msra.mxu2 %v1004_v14 }
  0x11   :  { %596 = vmatpush.bf16.msra.mxu3 %v1012_v15 }
  0x12   :  { %558 = vmatpush.bf16.msra.mxu0 %v987_v16 }
  0x13   :  { %571 = vmatpush.bf16.msra.mxu1 %v995_v17 }
  0x14   :  { %584 = vmatpush.bf16.msra.mxu2 %v1003_v18 }
  0x15   :  { %597 = vmatpush.bf16.msra.mxu3 %v1011_v19 }
  0x16   :  { %11 = vsyncpa [#allocation4], 0  ;;  %559 = vmatpush.bf16.msra.mxu0 %v986_v20  ;;  %v985_v24 = vld [vmem:[%s1340_s1 + $0x8] sm:$0xff]  ;;  %v984_v28 = vld [vmem:[%s1340_s1] sm:$0xff]  ;;  %vm662_vm0 = vcmask 523264   ;;  %vm708_vm4 = vcmask 57344  }
  0x17   :  { %572 = vmatpush.bf16.msra.mxu1 %v994_v21  ;;  %v993_v25 = vld [vmem:[%s1340_s1 + $0x48] sm:$0xff]  ;;  %v992_v29 = vld [vmem:[%s1340_s1 + $0x40] sm:$0xff]  ;;  %v1023_v32 = vld [vmem:[%s1340_s1 + $0x138] sm:$0xff] }
  0x18   :  { %585 = vmatpush.bf16.msra.mxu2 %v1002_v22  ;;  %v1001_v26 = vld [vmem:[%s1340_s1 + $0x88] sm:$0xff]  ;;  %v1000_v30 = vld [vmem:[%s1340_s1 + $0x80] sm:$0xff]  ;;  %v24_v33 = vld [vmem:[%s1339_s0 + $0x10] sm:$0xff] }
  0x19   :  { %598 = vmatpush.bf16.msra.mxu3 %v1010_v23  ;;  %v1009_v27 = vld [vmem:[%s1340_s1 + $0xc8] sm:$0xff]  ;;  %v1008_v31 = vld [vmem:[%s1340_s1 + $0xc0] sm:$0xff]  ;;  %v1031_v35 = vld [vmem:[%s1340_s1 + $0x178] sm:$0xff]  ;;  %v32_v40 = vpack.c.bf16 %v24_v33, %v24_v33 }
  0x1a   :  { %560 = vmatpush.bf16.msra.mxu0 %v985_v24  ;;  %v22_v34 = vld [vmem:[%s1339_s0] sm:$0xff]  ;;  %v25_v36 = vld [vmem:[%s1339_s0 + $0x18] sm:$0xff]  ;;  %v23_v37 = vld [vmem:[%s1339_s0 + $0x8] sm:$0xff] }
  0x1b   :  { %573 = vmatpush.bf16.msra.mxu1 %v993_v25  ;;  %v1039_v38 = vld [vmem:[%s1340_s1 + $0x1b8] sm:$0xff]  ;;  %v30_v41 = vpack.c.bf16 %v22_v34, %v22_v34  ;;  %v33_v42 = vpack.c.bf16 %v25_v36, %v25_v36  ;;  %v31_v43 = vpack.c.bf16 %v23_v37, %v23_v37  ;;  %v1022_v44 = vld [vmem:[%s1340_s1 + $0x130] sm:$0xff]  ;;  %v1021_v48 = vld [vmem:[%s1340_s1 + $0x128] sm:$0xff] }
  0x1c   :  { %586 = vmatpush.bf16.msra.mxu2 %v1001_v26  ;;  %v1047_v39 = vld [vmem:[%s1340_s1 + $0x1f8] sm:$0xff]  ;;  %v1030_v45 = vld [vmem:[%s1340_s1 + $0x170] sm:$0xff]  ;;  %v1029_v49 = vld [vmem:[%s1340_s1 + $0x168] sm:$0xff] }
  0x1d   :  { %599 = vmatpush.bf16.msra.mxu3 %v1009_v27  ;;  %v1038_v46 = vld [vmem:[%s1340_s1 + $0x1b0] sm:$0xff]  ;;  %v1037_v50 = vld [vmem:[%s1340_s1 + $0x1a8] sm:$0xff]  ;;  %v1020_v52 = vld [vmem:[%s1340_s1 + $0x120] sm:$0xff] }
  0x1e   :  { %561 = vmatpush.bf16.msra.mxu0 %v984_v28  ;;  %v1046_v47 = vld [vmem:[%s1340_s1 + $0x1f0] sm:$0xff]  ;;  %v1045_v51 = vld [vmem:[%s1340_s1 + $0x1e8] sm:$0xff]  ;;  %v1028_v53 = vld [vmem:[%s1340_s1 + $0x160] sm:$0xff] }
  0x1f   :  { %574 = vmatpush.bf16.msra.mxu1 %v992_v29  ;;  %v1036_v54 = vld [vmem:[%s1340_s1 + $0x1a0] sm:$0xff]  ;;  %v1019_v56 = vld [vmem:[%s1340_s1 + $0x118] sm:$0xff]  ;;  %v1018_v60 = vld [vmem:[%s1340_s1 + $0x110] sm:$0xff] }
  0x20   :  { %587 = vmatpush.bf16.msra.mxu2 %v1000_v30  ;;  %v1044_v55 = vld [vmem:[%s1340_s1 + $0x1e0] sm:$0xff]  ;;  %v1027_v57 = vld [vmem:[%s1340_s1 + $0x158] sm:$0xff]  ;;  %v1026_v61 = vld [vmem:[%s1340_s1 + $0x150] sm:$0xff] }
  0x21   :  { %600 = vmatpush.bf16.msra.mxu3 %v1008_v31  ;;  %562 = vmatmul.bf16.vlgmr.msra.gmra.mxu0 %v30_v41  ;;  %v1035_v58 = vld [vmem:[%s1340_s1 + $0x198] sm:$0xff]  ;;  %v1034_v62 = vld [vmem:[%s1340_s1 + $0x190] sm:$0xff]  ;;  %v1017_v0 = vld [vmem:[%s1340_s1 + $0x108] sm:$0xff] }
  0x22   :  { %606 = vmatpush.bf16.msrb.mxu0 %v1023_v32  ;;  %575 = vmatmul.bf16.vlgmr.msra.gmra.mxu1 %v31_v43  ;;  %v1043_v59 = vld [vmem:[%s1340_s1 + $0x1d8] sm:$0xff]  ;;  %v1042_v63 = vld [vmem:[%s1340_s1 + $0x1d0] sm:$0xff]  ;;  %v1025_v1 = vld [vmem:[%s1340_s1 + $0x148] sm:$0xff]  ;;  %v661_v43 = vstv %s1343_s4  ;;  %s717_s4 = sshll.u32 %s1344_s5, 4  ;;  %s718_s4 = int_to_ptr.hbm [resolvable:$true] %s717_s4 }
  0x23   :  { %619 = vmatpush.bf16.msrb.mxu1 %v1031_v35  ;;  %588 = vmatmul.bf16.vlgmr.msra.gmra.mxu2 %v32_v40  ;;  %v1033_v2 = vld [vmem:[%s1340_s1 + $0x188] sm:$0xff]  ;;  %v1016_v4 = vld [vmem:[%s1340_s1 + $0x100] sm:$0xff]  ;;  %v28_v10 = vld [vmem:[%s1339_s0 + $0x30] sm:$0xff] }
  0x24   :  { %632 = vmatpush.bf16.msrb.mxu2 %v1039_v38  ;;  %601 = vmatmul.bf16.vlgmr.msra.gmra.mxu3 %v33_v42  ;;  %v1041_v3 = vld [vmem:[%s1340_s1 + $0x1c8] sm:$0xff]  ;;  %v1024_v5 = vld [vmem:[%s1340_s1 + $0x140] sm:$0xff]  ;;  %v29_v11 = vld [vmem:[%s1339_s0 + $0x38] sm:$0xff]  ;;  %v36_v14 = vpack.c.bf16 %v28_v10, %v28_v10 }
  0x25   :  { %645 = vmatpush.bf16.msrb.mxu3 %v1047_v39  ;;  %v1032_v6 = vld [vmem:[%s1340_s1 + $0x180] sm:$0xff]  ;;  %v27_v8 = vld [vmem:[%s1339_s0 + $0x28] sm:$0xff]  ;;  %v37_v15 = vpack.c.bf16 %v29_v11, %v29_v11 }
  0x26   :  { %607 = vmatpush.bf16.msrb.mxu0 %v1022_v44  ;;  %v26_v7 = vld [vmem:[%s1339_s0 + $0x20] sm:$0xff]  ;;  %v35_v13 = vpack.c.bf16 %v27_v8, %v27_v8 }
  0x27   :  { %620 = vmatpush.bf16.msrb.mxu1 %v1030_v45  ;;  %v1040_v9 = vld [vmem:[%s1340_s1 + $0x1c0] sm:$0xff]  ;;  %v34_v12 = vpack.c.bf16 %v26_v7, %v26_v7 }
  0x28   :  { %633 = vmatpush.bf16.msrb.mxu2 %v1038_v46  ;;  %v1049_v22 = vld [vmem:[%s1341_s2] ss:$0 sm:$0xff] }
  0x29   :  { %646 = vmatpush.bf16.msrb.mxu3 %v1046_v47  ;;  %v659_v40 = vld [vmem:[%s1342_s3] sm:$0x1]  ;;  %s1080_s3 = smov [#allocation3]  }
  0x2a   :  { %608 = vmatpush.bf16.msrb.mxu0 %v1021_v48  ;;  %s715_s15 = sshll.u32 %s1080_s3, 4  ;;  %s716_s15 = int_to_ptr.vmem [resolvable:$true] %s715_s15 }
  0x2b   :  { %621 = vmatpush.bf16.msrb.mxu1 %v1029_v49 }
  0x2c   :  { %634 = vmatpush.bf16.msrb.mxu2 %v1037_v50 }
  0x2d   :  { %647 = vmatpush.bf16.msrb.mxu3 %v1045_v51 }
  0x2e   :  { %609 = vmatpush.bf16.msrb.mxu0 %v1020_v52 }
  0x2f   :  { %622 = vmatpush.bf16.msrb.mxu1 %v1028_v53 }
  0x30   :  { %635 = vmatpush.bf16.msrb.mxu2 %v1036_v54 }
  0x31   :  { %648 = vmatpush.bf16.msrb.mxu3 %v1044_v55 }
  0x32   :  { %610 = vmatpush.bf16.msrb.mxu0 %v1019_v56 }
  0x33   :  { %623 = vmatpush.bf16.msrb.mxu1 %v1027_v57 }
  0x34   :  { %636 = vmatpush.bf16.msrb.mxu2 %v1035_v58 }
  0x35   :  { %649 = vmatpush.bf16.msrb.mxu3 %v1043_v59 }
  0x36   :  { %611 = vmatpush.bf16.msrb.mxu0 %v1018_v60 }
  0x37   :  { %624 = vmatpush.bf16.msrb.mxu1 %v1026_v61 }
  0x38   :  { %637 = vmatpush.bf16.msrb.mxu2 %v1034_v62 }
  0x39   :  { %650 = vmatpush.bf16.msrb.mxu3 %v1042_v63 }
  0x3a   :  { %612 = vmatpush.bf16.msrb.mxu0 %v1017_v0 }
  0x3b   :  { %625 = vmatpush.bf16.msrb.mxu1 %v1025_v1 }
  0x3c   :  { %638 = vmatpush.bf16.msrb.mxu2 %v1033_v2 }
  0x3d   :  { %651 = vmatpush.bf16.msrb.mxu3 %v1041_v3 }
  0x3e   :  { %613 = vmatpush.bf16.msrb.mxu0 %v1016_v4 }
  0x3f   :  { %626 = vmatpush.bf16.msrb.mxu1 %v1024_v5 }
  0x40   :  { %639 = vmatpush.bf16.msrb.mxu2 %v1032_v6 }
  0x41   :  { %652 = vmatpush.bf16.msrb.mxu3 %v1040_v9  ;;  %614 = vmatmul.bf16.vlgmr.msrb.gmra.mxu0 %v34_v12 }
  0x42   :  { %627 = vmatmul.bf16.vlgmr.msrb.gmra.mxu1 %v35_v13 }
  0x43   :  { %640 = vmatmul.bf16.vlgmr.msrb.gmra.mxu2 %v36_v14 }
  0x44   :  { %653 = vmatmul.bf16.vlgmr.msrb.gmra.mxu3 %v37_v15 }
  0x9e   :  { %v563_v16 = vpop.f32.mrf.mxu0 }
  0x9f   :  { %v576_v17 = vpop.f32.mrf.mxu1  ;;  %v564_v25 = vadd.f32 %v1049_v22, %v563_v16 }
  0xa1   :  { %v577_v26 = vadd.f32 %v576_v17, %v564_v25 }
  0xa6   :  { %v589_v18 = vpop.f32.mrf.mxu2  ;;  %v565_v20 = vpop.f32.mrf.mxu0 }
  0xa7   :  { %v602_v19 = vpop.f32.mrf.mxu3  ;;  %v578_v21 = vpop.f32.mrf.mxu1  ;;  %v590_v27 = vadd.f32 %v589_v18, %v577_v26 }
  0xa9   :  { %v603_v28 = vadd.f32 %v602_v19, %v590_v27 }
  0xae   :  { %v591_v23 = vpop.f32.mrf.mxu2 }
  0xaf   :  { %v604_v24 = vpop.f32.mrf.mxu3 }
  0xbe   :  { %v615_v29 = vpop.f32.mrf.mxu0 }
  0xbf   :  { %v628_v30 = vpop.f32.mrf.mxu1  ;;  %v616_v31 = vadd.f32 %v615_v29, %v603_v28 }
  0xc1   :  { %v629_v32 = vadd.f32 %v628_v30, %v616_v31 }
  0xc6   :  { %v641_v33 = vpop.f32.mrf.mxu2  ;;  %v617_v36 = vpop.f32.mrf.mxu0 }
  0xc7   :  { %v654_v34 = vpop.f32.mrf.mxu3  ;;  %v642_v35 = vadd.f32 %v641_v33, %v629_v32  ;;  %v630_v37 = vpop.f32.mrf.mxu1 }
  0xc9   :  { %v655_v38 = vadd.f32 %v654_v34, %v642_v35 }
  0xcb   :  { %v658_v39 = vmax.f32 %v655_v38, 0.0 }
  0xcd   :  { %982 = vmatpush.xpose.msk.msra.mxu0 %vm662_vm0, %v658_v39 }
  0xce   :  { %v643_v41 = vpop.f32.mrf.mxu2 }
  0xcf   :  { %v656_v42 = vpop.f32.mrf.mxu3 }
  0xd0   :  { %983 = vmatmul.msk.f32.vlgmr.msra.gmra.mxu0 %vm662_vm0, %v659_v40 }
 0x14d   :  { %v686_v44 = vpop.f32.mrf.mxu0 }
 0x14e   :  { %v687_v45 = vadd.f32 %v686_v44, %v661_v43 }
 0x150   :  { %v689_v46 = vsub.f32 0.0, %v687_v45 }
 0x152   :  { %v690_v47 = vmul.f32 1.442695, %v689_v46 }
 0x154   :  { %1050 = vpow2.f32 %v690_v47 }
 0x15a   :  { %v1051_v48 = vpop.eup %1050 }
 0x15b   :  { %v692_v49 = vadd.f32 1.0, %v1051_v48 }
 0x15d   :  { %1052 = vrcp.f32 %v692_v49  ;;  %v704_v53 = vand.u32 2147483648, %v692_v49  ;;  %v702_v55 = vand.u32 2147483647, %v692_v49  ;;  %vm698_vm2 = vweird.f32 %v692_v49 }
 0x15f   :  { %v705_v57 = vor.u32 1.1754944e-38, %v704_v53  ;;  %vm703_vm5 = vcmp.eq.f32.partialorder %v702_v55, 8.507059e+37 }
 0x163   :  { %v1053_v50 = vpop.eup %1052 }
 0x164   :  { %v694_v51 = vmul.f32 %v1053_v50, %v692_v49  ;;  %vm699_vm1 = vweird.f32 %v1053_v50 }
 0x165   :  { %vm700_vm3 = vmor %vm698_vm2, %vm699_vm1 }
 0x166   :  { %v695_v52 = vsub.f32 1.0, %v694_v51 }
 0x168   :  { %v696_v54 = vmul.f32 %v1053_v50, %v695_v52 }
 0x16a   :  { %v697_v56 = vadd.f32 %v1053_v50, %v696_v54 }
 0x16c   :  { %v701_v58 = vsel %vm700_vm3, %v1053_v50, %v697_v56 }
 0x16d   :  { %v706_v59 = vsel %vm703_vm5, %v705_v57, %v701_v58 }
 0x16e   :  { %709 = vst.msk [vmem:[#allocation3] sm:$0x1] %vm708_vm4, %v706_v59 }
 0x16f   :  { %720 = dma.vmem_to_hbm [thread:$0]  %s716_s15, 16, %s718_s4, [#allocation4]  }
 0x170   :  { %1078 = dma.done.wait [#allocation4], 16  }
 0x171   :  { %1079 = vsyncadd [#allocation4], 4294967280 }
 0x172   :  { %725 = vsyncpa [#allocation4], 1 }

</bundles_post_ra>
